<compile_context>
chip_gen: v7x
topology: tpu7x:2x2x1
jax: 0.10.0
libtpu: 0.0.40
codegen_flags: <defaults>
</compile_context>

<pallas_src>
import functools

import jax
import jax.numpy as jnp
from jax.experimental import pallas as pl
from jax.experimental.pallas import tpu as pltpu

IN_DIM = 784
HID_DIM = 125
OUT_DIM = 10
HID_PAD = 128          # lane-padded hidden width
OUT_PAD = 128          # lane-padded output width (lane-dense vst)
DEFAULT_TILE_B = 4096  # ~29 MiB double-buffered working set with f32 x tiles


def _cdiv(a, b):
    return (a + b - 1) // b


def mlp_kernel(x_ref, w1_ref, b1_ref, w2_ref, b2_ref, o_ref):
    # Cast x to bf16 in-kernel (VPU, free under the DMA) instead of in the wrapper.
    x = x_ref[...].astype(jnp.bfloat16)
    # Hidden layer: (TB, 784)bf16 @ (784, 128)bf16 -> f32 acc, + bias, ReLU.
    h = jnp.dot(x, w1_ref[...], preferred_element_type=jnp.float32)
    h = jnp.maximum(h + b1_ref[...], 0.0)
    # Output layer: (TB, 128)bf16 @ (128, 128)bf16 -> f32 acc, + bias, store bf16.
    out = jnp.dot(h.astype(jnp.bfloat16), w2_ref[...],
                  preferred_element_type=jnp.float32)
    o_ref[...] = (out + b2_ref[...]).astype(o_ref.dtype)


def prepare_params(w1, b1, w2, b2):
    """One-time weight prep: transpose to (in, out), zero-pad to lane multiples,
    cast matmul operands to bf16.  Call once at init, not per forward."""
    # (125, 784) -> (784, 128); padded columns are exactly zero.
    w1t = jnp.zeros((IN_DIM, HID_PAD), jnp.float32).at[:, :HID_DIM].set(w1.T)
    b1p = jnp.zeros((1, HID_PAD), jnp.float32).at[:, :HID_DIM].set(b1)
    # (10, 125) -> (128, 128); padded rows/cols are exactly zero.
    w2t = jnp.zeros((HID_PAD, OUT_PAD), jnp.float32).at[:HID_DIM, :OUT_DIM].set(w2.T)
    b2p = jnp.zeros((1, OUT_PAD), jnp.float32).at[:, :OUT_DIM].set(b2)
    return (w1t.astype(jnp.bfloat16), b1p,
            w2t.astype(jnp.bfloat16), b2p)


def _choose_tile(B, tile_b):
    """Batch tile: multiple of 16, capped at tile_b, and for large B choose
    >= 2 grid blocks so both v7x TensorCores get work."""
    if B <= 32:
        tb = ((B + 15) // 16) * 16
    else:
        n_blocks = max(2, _cdiv(B, tile_b))
        tb = ((_cdiv(B, n_blocks) + 15) // 16) * 16
        tb = min(tb, tile_b)
    return max(16, tb)


@functools.partial(jax.jit, static_argnames=("tile_b",))
def mlp_forward(x, w1t, b1p, w2t, b2p, *, tile_b=DEFAULT_TILE_B):
    """x: (B, 784) f32.  Prepared params from prepare_params().
    Returns (B, 10) f32, matching relu(x @ w1.T + b1) @ w2.T + b2
    (operands in bf16, f32 accumulation, bf16 output store)."""
    B = x.shape[0]
    tb = _choose_tile(B, tile_b)
    n_blocks = _cdiv(B, tb)

    flops = 2 * B * IN_DIM * HID_PAD + 2 * B * HID_PAD * OUT_PAD
    bytes_accessed = (x.size * 4                # f32 x read
                      + w1t.size * 2 + w2t.size * 2
                      + b1p.size * 4 + b2p.size * 4
                      + B * OUT_PAD * 2)        # bf16 output write

    out_padded = pl.pallas_call(
        mlp_kernel,
        out_shape=jax.ShapeDtypeStruct((B, OUT_PAD), jnp.bfloat16),
        grid_spec=pltpu.PrefetchScalarGridSpec(
            num_scalar_prefetch=0,
            grid=(n_blocks,),
            in_specs=[
                pl.BlockSpec((tb, IN_DIM), lambda i: (i, 0)),        # x tile (f32)
                pl.BlockSpec((IN_DIM, HID_PAD), lambda i: (0, 0)),   # w1t (resident)
                pl.BlockSpec((1, HID_PAD), lambda i: (0, 0)),        # b1
                pl.BlockSpec((HID_PAD, OUT_PAD), lambda i: (0, 0)),  # w2t (resident)
                pl.BlockSpec((1, OUT_PAD), lambda i: (0, 0)),        # b2
            ],
            out_specs=pl.BlockSpec((tb, OUT_PAD), lambda i: (i, 0)),
        ),
        compiler_params=pltpu.CompilerParams(
            dimension_semantics=("parallel",),
            vmem_limit_bytes=56 * 1024 * 1024,
        ),
        cost_estimate=pl.CostEstimate(
            flops=flops, transcendentals=0, bytes_accessed=bytes_accessed),
    )(x, w1t, b1p, w2t, b2p)

    # Tiny (B, 10) slice; cast back to f32 for downstream convenience.
    return out_padded[:, :OUT_DIM].astype(jnp.float32)


def init_params(key):
    """Deterministic init mimicking nn.Linear default (uniform +/- 1/sqrt(fan_in))."""
    k1, k2, k3, k4 = jax.random.split(key, 4)
    bound1 = 1.0 / jnp.sqrt(float(IN_DIM))
    bound2 = 1.0 / jnp.sqrt(float(HID_DIM))
    w1 = jax.random.uniform(k1, (HID_DIM, IN_DIM), jnp.float32, -bound1, bound1)
    b1 = jax.random.uniform(k2, (HID_DIM,), jnp.float32, -bound1, bound1)
    w2 = jax.random.uniform(k3, (OUT_DIM, HID_DIM), jnp.float32, -bound2, bound2)
    b2 = jax.random.uniform(k4, (OUT_DIM,), jnp.float32, -bound2, bound2)
    return w1, b1, w2, b2


if __name__ == "__main__":
    key = jax.random.PRNGKey(0)
    kx, kp = jax.random.split(key)

    B = 8
    x = jax.random.normal(kx, (B, IN_DIM), jnp.float32)
    w1, b1, w2, b2 = init_params(kp)

    # One-time weight prep (transpose / pad / bf16 cast) outside the forward.
    w1t, b1p, w2t, b2p = prepare_params(w1, b1, w2, b2)

    out = mlp_forward(x, w1t, b1p, w2t, b2p)
    out = jax.block_until_ready(out)
    assert out.shape == (B, OUT_DIM)

    # Reference 1: same bf16-rounded operands, f32 accumulation, bf16 output store.
    xb = x.astype(jnp.bfloat16).astype(jnp.float32)
    w1b = w1.astype(jnp.bfloat16).astype(jnp.float32)
    w2b = w2.astype(jnp.bfloat16).astype(jnp.float32)
    hb = jnp.maximum(xb @ w1b.T + b1, 0.0).astype(jnp.bfloat16).astype(jnp.float32)
    ref_bf16 = (hb @ w2b.T + b2).astype(jnp.bfloat16).astype(jnp.float32)
    assert jnp.allclose(out, ref_bf16, atol=1e-2, rtol=1e-2)

    # Reference 2: full-f32 PyTorch-semantics forward (loose tol for bf16 path).
    # NOTE: operands/activations/output are bf16-rounded inside the kernel; this
    # intentionally deviates from pure f32 PyTorch semantics within ~3e-2.
    ref_f32 = jnp.maximum(x @ w1.T + b1, 0.0) @ w2.T + b2
    assert jnp.allclose(out, ref_f32, atol=3e-2, rtol=3e-2)

    print("KERNEL_OK")
</pallas_src>

<mosaic_0001>
module attributes {stable_mosaic.version = 11 : i64} {
  func.func @mlp_kernel(%arg0: i32, %arg1: memref<16x784xf32, #tpu.memory_space<vmem>>, %arg2: memref<784x128xbf16, #tpu.memory_space<vmem>>, %arg3: memref<1x128xf32, #tpu.memory_space<vmem>>, %arg4: memref<128x128xbf16, #tpu.memory_space<vmem>>, %arg5: memref<1x128xf32, #tpu.memory_space<vmem>>, %arg6: memref<16x128xbf16, #tpu.memory_space<vmem>>) attributes {dimension_semantics = [#tpu.dimension_semantics<parallel>], iteration_bounds = array<i64: 1>, scalar_prefetch = 0 : i64, scratch_operands = 0 : i64, tpu.core_type = #tpu.core_type<tc>, window_params = [{transform_indices = @transform_0, window_bounds = array<i64: 16, 784>}, {pipeline_mode = #tpu.pipeline_mode<synchronous>, transform_indices = @transform_1, window_bounds = array<i64: 784, 128>}, {pipeline_mode = #tpu.pipeline_mode<synchronous>, transform_indices = @transform_2, window_bounds = array<i64: 1, 128>}, {pipeline_mode = #tpu.pipeline_mode<synchronous>, transform_indices = @transform_3, window_bounds = array<i64: 128, 128>}, {pipeline_mode = #tpu.pipeline_mode<synchronous>, transform_indices = @transform_4, window_bounds = array<i64: 1, 128>}, {transform_indices = @transform_5, window_bounds = array<i64: 16, 128>}]} {
    %c0 = arith.constant 0 : index
    %c0_0 = arith.constant 0 : index
    %0 = vector.load %arg1[%c0, %c0_0] : memref<16x784xf32, #tpu.memory_space<vmem>>, vector<16x784xf32>
    %1 = arith.truncf %0 : vector<16x784xf32> to vector<16x784xbf16>
    %c0_1 = arith.constant 0 : index
    %c0_2 = arith.constant 0 : index
    %2 = vector.load %arg2[%c0_1, %c0_2] : memref<784x128xbf16, #tpu.memory_space<vmem>>, vector<784x128xbf16>
    %cst = arith.constant dense<0.000000e+00> : vector<16x128xf32>
    %3 = tpu.matmul %1, %2, %cst {dimension_numbers = #tpu.dot_dimension_numbers<[1], [0], [0], [1], [0, 0, 1, 1], [], []>} : vector<16x784xbf16>, vector<784x128xbf16>, vector<16x128xf32> -> vector<16x128xf32>
    %c0_3 = arith.constant 0 : index
    %c0_4 = arith.constant 0 : index
    %4 = vector.load %arg3[%c0_3, %c0_4] : memref<1x128xf32, #tpu.memory_space<vmem>>, vector<1x128xf32>
    %5 = vector.broadcast %4 : vector<1x128xf32> to vector<16x128xf32>
    %6 = arith.addf %3, %5 : vector<16x128xf32>
    %cst_5 = arith.constant 0.000000e+00 : f32
    %7 = vector.broadcast %cst_5 : f32 to vector<16x128xf32>
    %8 = arith.maximumf %6, %7 : vector<16x128xf32>
    %9 = arith.truncf %8 : vector<16x128xf32> to vector<16x128xbf16>
    %c0_6 = arith.constant 0 : index
    %c0_7 = arith.constant 0 : index
    %10 = vector.load %arg4[%c0_6, %c0_7] : memref<128x128xbf16, #tpu.memory_space<vmem>>, vector<128x128xbf16>
    %cst_8 = arith.constant dense<0.000000e+00> : vector<16x128xf32>
    %11 = tpu.matmul %9, %10, %cst_8 {dimension_numbers = #tpu.dot_dimension_numbers<[1], [0], [0], [1], [0, 0, 1, 1], [], []>} : vector<16x128xbf16>, vector<128x128xbf16>, vector<16x128xf32> -> vector<16x128xf32>
    %c0_9 = arith.constant 0 : index
    %c0_10 = arith.constant 0 : index
    %12 = vector.load %arg5[%c0_9, %c0_10] : memref<1x128xf32, #tpu.memory_space<vmem>>, vector<1x128xf32>
    %13 = vector.broadcast %12 : vector<1x128xf32> to vector<16x128xf32>
    %14 = arith.addf %11, %13 : vector<16x128xf32>
    %15 = arith.truncf %14 : vector<16x128xf32> to vector<16x128xbf16>
    %c0_11 = arith.constant 0 : index
    %c0_12 = arith.constant 0 : index
    %16 = vector.load %arg6[%c0_11, %c0_12] : memref<16x128xbf16, #tpu.memory_space<vmem>>, vector<16x128xbf16>
    tpu.vector_store %arg6[%c0_11, %c0_12], %15 {strides = array<i32>} : memref<16x128xbf16, #tpu.memory_space<vmem>>, vector<16x128xbf16>,
    return
  }
  func.func @transform_0(%arg0: i32) -> (i32, i32) {
    %c0_i32 = arith.constant 0 : i32
    %c0_i32_0 = arith.constant 0 : i32
    return %arg0, %c0_i32 : i32, i32
  }
  func.func @transform_1(%arg0: i32) -> (i32, i32) {
    %c0_i32 = arith.constant 0 : i32
    %c0_i32_0 = arith.constant 0 : i32
    %c0_i32_1 = arith.constant 0 : i32
    return %c0_i32, %c0_i32_0 : i32, i32
  }
  func.func @transform_2(%arg0: i32) -> (i32, i32) {
    %c0_i32 = arith.constant 0 : i32
    %c0_i32_0 = arith.constant 0 : i32
    %c0_i32_1 = arith.constant 0 : i32
    return %c0_i32, %c0_i32_0 : i32, i32
  }
  func.func @transform_3(%arg0: i32) -> (i32, i32) {
    %c0_i32 = arith.constant 0 : i32
    %c0_i32_0 = arith.constant 0 : i32
    %c0_i32_1 = arith.constant 0 : i32
    return %c0_i32, %c0_i32_0 : i32, i32
  }
  func.func @transform_4(%arg0: i32) -> (i32, i32) {
    %c0_i32 = arith.constant 0 : i32
    %c0_i32_0 = arith.constant 0 : i32
    %c0_i32_1 = arith.constant 0 : i32
    return %c0_i32, %c0_i32_0 : i32, i32
  }
  func.func @transform_5(%arg0: i32) -> (i32, i32) {
    %c0_i32 = arith.constant 0 : i32
    %c0_i32_0 = arith.constant 0 : i32
    return %arg0, %c0_i32 : i32, i32
  }
}

</mosaic_0001>

<bundles_post_ra>
// kernel: mlp_forward.1
= control target key start
LH: loop header
LB: loop body
LE: loop exit
PB: predicated region body
PF: predicated region fallthrough
CT: control target
= control target key end

     0   :  { %10 = vsyncpa [#allocation3], 0  ;;  %s1227_s0 = inlined_call_operand.hbm [shape: f32[8,784], index: 0, kind: input, shape index: {}]   ;;  %s1228_s1 = inlined_call_operand.hbm [shape: bf16[784,128], index: 1, kind: input, shape index: {}]   ;;  %s1229_s2 = inlined_call_operand.vmem [shape: f32[1,128], index: 2, kind: input, shape index: {}]   ;;  %s1230_s3 = inlined_call_operand.hbm [shape: bf16[128,128], index: 3, kind: input, shape index: {}]   ;;  %s1231_s4 = inlined_call_operand.vmem [shape: f32[1,128], index: 4, kind: input, shape index: {}]   ;;  %s1232_s5 = inlined_call_operand.vmem [shape: bf16[8,128], index: 5, kind: output, shape index: {}]  }
   0x1   :  { %11 = vsyncpa [#allocation5], 0 }
   0x2   :  { %16 = vsyncadd [#allocation3], 896  ;;  %s1124_s18 = smov [#allocation4]   ;;  %s1054_s22 = scalar_lea.hbm %s1228_s1, 6272 }
   0x3   :  { %s29_s19 = sshll.u32 %s1124_s18, 4  ;;  %p1055_p0 = scmp.ne.s32.totalorder %s1228_s1, %s1054_s22  ;;  %s30_s19 = int_to_ptr.vmem [resolvable:$true] %s29_s19 }
   0x4   :  { %p1058_p1 = scmp.lt.u32.totalorder %s1054_s22, %s1228_s1 }
   0x6   :  { %p1060_p2 = pnand %p1058_p1, %p1055_p0 }
   0x8   :  { %1063 = shalt.err (!%p1060_p2)
}
   0x9   :  { %s1064_s27 = scalar_lea.vmem %s30_s19, 6272  ;;  %p1069_p4 = scmp.lt.s32.totalorder %s30_s19, %s30_s19 }
   0xa   :  { %p1065_p3 = scmp.ne.s32.totalorder %s30_s19, %s1064_s27  ;;  %p1070_p5 = scmp.lt.s32.totalorder %s1064_s27, %s1064_s27 }
   0xc   :  { %p1071_p6 = por %p1070_p5, %p1069_p4 }
   0xe   :  { %p1072_p7 = pnand %p1071_p6, %p1065_p3 }
  0x10   :  { %1075 = shalt.err (!%p1072_p7)
}
  0x11   :  { %s1125_s28 = smov 64   ;;  %s1126_s29 = smov 4  }
  0x12   :  { %35 = dma.hbm_to_vmem [thread:$0]  %s1228_s1, 6272, %s30_s19, [#allocation5], %s1125_s28, %s1125_s28, %s1126_s29  }
  0x13   :  { %s1127_s7 = smov [#allocation2]   ;;  %s1076_s11 = scalar_lea.hbm %s1227_s0, 896 }
  0x14   :  { %s17_s8 = sshll.u32 %s1127_s7, 4  ;;  %p1077_p8 = scmp.ne.s32.totalorder %s1227_s0, %s1076_s11  ;;  %s18_s8 = int_to_ptr.vmem [resolvable:$true] %s17_s8 }
  0x15   :  { %p1080_p9 = scmp.lt.u32.totalorder %s1076_s11, %s1227_s0 }
  0x17   :  { %p1082_p10 = pnand %p1080_p9, %p1077_p8 }
  0x19   :  { %1085 = shalt.err (!%p1082_p10)
}
  0x1a   :  { %s1086_s16 = scalar_lea.vmem %s18_s8, 896  ;;  %s1090_s1 = scalar_lea.vmem %s18_s8, 1792 }
  0x1b   :  { %p1087_p11 = scmp.ne.s32.totalorder %s18_s8, %s1086_s16  ;;  %p1091_p12 = scmp.lt.s32.totalorder %s18_s8, %s18_s8 }
  0x1c   :  { %p1092_p13 = scmp.lt.s32.totalorder %s1090_s1, %s1086_s16 }
  0x1e   :  { %p1093_p0 = por %p1092_p13, %p1091_p12 }
  0x20   :  { %p1094_p1 = pnand %p1093_p0, %p1087_p11 }
  0x22   :  { %1097 = shalt.err (!%p1094_p1)
}
  0x23   :  { %s1128_s17 = smov 896   ;;  %s1129_s18 = smov 56  }
  0x24   :  { %23 = dma.hbm_to_vmem [thread:$0]  %s1227_s0, 896, %s18_s8, [#allocation3], %s1128_s17, %s1128_s17, %s1129_s18  }
  0x25   :  { %s1130_s21 = smov [#allocation6]   ;;  %s1098_s25 = scalar_lea.hbm %s1230_s3, 1024 }
  0x26   :  { %s43_s22 = sshll.u32 %s1130_s21, 4  ;;  %p1099_p2 = scmp.ne.s32.totalorder %s1230_s3, %s1098_s25  ;;  %s44_s22 = int_to_ptr.vmem [resolvable:$true] %s43_s22 }
  0x27   :  { %p1102_p3 = scmp.lt.u32.totalorder %s1098_s25, %s1230_s3 }
  0x29   :  { %p1104_p4 = pnand %p1102_p3, %p1099_p2 }
  0x2b   :  { %1107 = shalt.err (!%p1104_p4)
}
  0x2c   :  { %s1108_s7 = scalar_lea.vmem %s44_s22, 1024  ;;  %p1113_p6 = scmp.lt.s32.totalorder %s44_s22, %s44_s22 }
  0x2d   :  { %p1109_p5 = scmp.ne.s32.totalorder %s44_s22, %s1108_s7  ;;  %p1114_p7 = scmp.lt.s32.totalorder %s1108_s7, %s1108_s7 }
  0x2f   :  { %p1115_p8 = por %p1114_p7, %p1113_p6 }
  0x31   :  { %p1116_p9 = pnand %p1115_p8, %p1109_p5 }
  0x33   :  { %1119 = shalt.err (!%p1116_p9)
}
  0x34   :  { %49 = dma.hbm_to_vmem [thread:$0]  %s1230_s3, 1024, %s44_s22, [#allocation5], %s1125_s28, %s1125_s28, %s1126_s29  }
  0x35   :  { %1120 = dma.done.wait [#allocation3], 1792  }
  0x36   :  { %1121 = vsyncadd [#allocation3], 4294965504 }
  0x37   :  { %1122 = dma.done.wait [#allocation5], 7296  }
  0x38   :  { %1123 = vsyncadd [#allocation5], 4294960000  ;;  %v997_v0 = vld [vmem:[#allocation4 + $0x40] sm:$0xff]   ;;  %v1001_v4 = vld [vmem:[#allocation4 + $0x48] sm:$0xff]   ;;  %v1131_v43 = vmov 0.0   ;;  %vm1132_vm0 = vmmov 0  }
  0x39   :  { %v998_v1 = vld [vmem:[#allocation4] sm:$0xff]   ;;  %885 = vmatprep.subr.bf16.mxu0 %v997_v0  ;;  %v1002_v5 = vld [vmem:[#allocation4 + $0x8] sm:$0xff]   ;;  %v1005_v8 = vld [vmem:[#allocation4 + $0x50] sm:$0xff]   ;;  %vm482_vm1 = vcmask 130048  }
  0x3a   :  { %v999_v2 = vld [vmem:[#allocation4 + $0xc0] sm:$0xff]   ;;  %886 = vmatpush3.bf16.msra.mxu0 %v998_v1  ;;  %v1003_v6 = vld [vmem:[#allocation4 + $0xc8] sm:$0xff]   ;;  %v1006_v9 = vld [vmem:[#allocation4 + $0x10] sm:$0xff]  }
  0x3b   :  { %v1000_v3 = vld [vmem:[#allocation4 + $0x80] sm:$0xff]   ;;  %907 = vmatprep.subr.bf16.mxu1 %v999_v2  ;;  %887 = vmatprep.subr.bf16.mxu0 %v1001_v4  ;;  %v1004_v7 = vld [vmem:[#allocation4 + $0x88] sm:$0xff]   ;;  %v1007_v10 = vld [vmem:[#allocation4 + $0xd0] sm:$0xff]  }
  0x3c   :  { %908 = vmatpush3.bf16.msra.mxu1 %v1000_v3  ;;  %v1008_v11 = vld [vmem:[#allocation4 + $0x90] sm:$0xff]   ;;  %v1009_v12 = vld [vmem:[#allocation4 + $0x58] sm:$0xff]   ;;  %v1013_v16 = vld [vmem:[#allocation4 + $0x60] sm:$0xff]  }
  0x3d   :  { %909 = vmatprep.subr.bf16.mxu1 %v1003_v6  ;;  %v1010_v13 = vld [vmem:[#allocation4 + $0x18] sm:$0xff]   ;;  %v1014_v17 = vld [vmem:[#allocation4 + $0x20] sm:$0xff]   ;;  %v1017_v20 = vld [vmem:[#allocation4 + $0x68] sm:$0xff]  }
  0x3e   :  { %888 = vmatpush3.bf16.msra.mxu0 %v1002_v5  ;;  %v1011_v14 = vld [vmem:[#allocation4 + $0xd8] sm:$0xff]   ;;  %v1015_v18 = vld [vmem:[#allocation4 + $0xe0] sm:$0xff]   ;;  %v1018_v21 = vld [vmem:[#allocation4 + $0x28] sm:$0xff]  }
  0x3f   :  { %889 = vmatprep.subr.bf16.mxu0 %v1005_v8  ;;  %v1012_v15 = vld [vmem:[#allocation4 + $0x98] sm:$0xff]   ;;  %v1016_v19 = vld [vmem:[#allocation4 + $0xa0] sm:$0xff]   ;;  %v1019_v22 = vld [vmem:[#allocation4 + $0xe8] sm:$0xff]  }
  0x40   :  { %910 = vmatpush3.bf16.msra.mxu1 %v1004_v7  ;;  %v1020_v23 = vld [vmem:[#allocation4 + $0xa8] sm:$0xff]   ;;  %v1021_v24 = vld [vmem:[#allocation4 + $0x70] sm:$0xff]   ;;  %v1025_v28 = vld [vmem:[#allocation4 + $0x78] sm:$0xff]  }
  0x41   :  { %911 = vmatprep.subr.bf16.mxu1 %v1007_v10  ;;  %v1022_v25 = vld [vmem:[#allocation4 + $0x30] sm:$0xff]   ;;  %v1026_v29 = vld [vmem:[#allocation4 + $0x38] sm:$0xff]   ;;  %v69_v36 = vld [vmem:[#allocation2 + $0x38] sm:$0xff] }
  0x42   :  { %890 = vmatpush3.bf16.msra.mxu0 %v1006_v9  ;;  %v1023_v26 = vld [vmem:[#allocation4 + $0xf0] sm:$0xff]   ;;  %v1027_v30 = vld [vmem:[#allocation4 + $0xf8] sm:$0xff]   ;;  %v1029_v38 = vld [vmem:[#allocation4 + $0x140] sm:$0xff]  }
  0x43   :  { %891 = vmatprep.subr.bf16.mxu0 %v1009_v12  ;;  %v1024_v27 = vld [vmem:[#allocation4 + $0xb0] sm:$0xff]   ;;  %v63_v31 = vld [vmem:[#allocation2 + $0x8] sm:$0xff]  ;;  %v65_v39 = vld [vmem:[#allocation2 + $0x18] sm:$0xff] }
  0x44   :  { %912 = vmatpush3.bf16.msra.mxu1 %v1008_v11  ;;  %v70_v32 = vld [vmem:[#allocation2 + $0x40] sm:$0xff]  ;;  %v1028_v34 = vld [vmem:[#allocation4 + $0xb8] sm:$0xff]   ;;  %v72_v40 = vld [vmem:[#allocation2 + $0x50] sm:$0xff] }
  0x45   :  { %913 = vmatprep.subr.bf16.mxu1 %v1011_v14  ;;  %v77_v33 = vpack.c.bf16 %v70_v32, %v63_v31  ;;  %v62_v35 = vld [vmem:[#allocation2] sm:$0xff]  ;;  %v79_v41 = vpack.c.bf16 %v72_v40, %v65_v39  ;;  %v1030_v42 = vld [vmem:[#allocation4 + $0x100] sm:$0xff]   ;;  %v71_v45 = vld [vmem:[#allocation2 + $0x48] sm:$0xff] }
  0x46   :  { %892 = vmatpush3.bf16.msra.mxu0 %v1010_v13  ;;  %v76_v37 = vpack.c.bf16 %v69_v36, %v62_v35  ;;  %v64_v44 = vld [vmem:[#allocation2 + $0x10] sm:$0xff]  ;;  %v1031_v47 = vld [vmem:[#allocation4 + $0x148] sm:$0xff]   ;;  %v1033_v49 = vld [vmem:[#allocation4 + $0x150] sm:$0xff]  }
  0x47   :  { %893 = vmatprep.subr.bf16.mxu0 %v1013_v16  ;;  %518 = vmatprep.mubr.bf16.mxu0 %v77_v33  ;;  %v78_v46 = vpack.c.bf16 %v71_v45, %v64_v44  ;;  %v1032_v48 = vld [vmem:[#allocation4 + $0x108] sm:$0xff]   ;;  %v1034_v50 = vld [vmem:[#allocation4 + $0x110] sm:$0xff]   ;;  %v1035_v51 = vld [vmem:[#allocation4 + $0x158] sm:$0xff]  }
  0x48   :  { %914 = vmatpush3.bf16.msra.mxu1 %v1012_v15  ;;  %559 = vmatprep.mubr.bf16.mxu1 %v79_v41  ;;  %v1036_v52 = vld [vmem:[#allocation4 + $0x118] sm:$0xff]   ;;  %v1037_v53 = vld [vmem:[#allocation4 + $0x160] sm:$0xff]   ;;  %v1039_v55 = vld [vmem:[#allocation4 + $0x168] sm:$0xff]  }
  0x49   :  { %915 = vmatprep.subr.bf16.mxu1 %v1015_v18  ;;  %v1038_v54 = vld [vmem:[#allocation4 + $0x120] sm:$0xff]   ;;  %v67_v57 = vld [vmem:[#allocation2 + $0x28] sm:$0xff]  ;;  %v1040_v58 = vld [vmem:[#allocation4 + $0x128] sm:$0xff]  }
  0x4a   :  { %894 = vmatpush3.bf16.msra.mxu0 %v1014_v17  ;;  %v1045_v56 = vld [vmem:[#allocation4 + $0x180] sm:$0xff]   ;;  %v1041_v59 = vld [vmem:[#allocation4 + $0x170] sm:$0xff]   ;;  %v75_v63 = vld [vmem:[#allocation2 + $0x68] sm:$0xff] }
  0x4b   :  { %895 = vmatprep.subr.bf16.mxu0 %v1017_v20  ;;  %v74_v60 = vld [vmem:[#allocation2 + $0x60] sm:$0xff]  ;;  %v68_v62 = vld [vmem:[#allocation2 + $0x30] sm:$0xff]  ;;  %v1043_v2 = vld [vmem:[#allocation4 + $0x178] sm:$0xff]  }
  0x4c   :  { %916 = vmatpush3.bf16.msra.mxu1 %v1016_v19  ;;  %v81_v61 = vpack.c.bf16 %v74_v60, %v67_v57  ;;  %v82_v0 = vpack.c.bf16 %v75_v63, %v68_v62  ;;  %v1042_v1 = vld [vmem:[#allocation4 + $0x130] sm:$0xff]   ;;  %v1044_v3 = vld [vmem:[#allocation4 + $0x138] sm:$0xff]   ;;  %v73_v5 = vld [vmem:[#allocation2 + $0x58] sm:$0xff] }
  0x4d   :  { %917 = vmatprep.subr.bf16.mxu1 %v1019_v22  ;;  %v66_v4 = vld [vmem:[#allocation2 + $0x20] sm:$0xff]  ;;  %v1046_v7 = vld [vmem:[#allocation6] sm:$0xff]   ;;  %v1048_v9 = vld [vmem:[#allocation6 + $0x10] sm:$0xff]  }
  0x4e   :  { %896 = vmatpush3.bf16.msra.mxu0 %v1018_v21  ;;  %v80_v6 = vpack.c.bf16 %v73_v5, %v66_v4  ;;  %v1047_v8 = vld [vmem:[#allocation6 + $0x8] sm:$0xff]   ;;  %v1049_v10 = vld [vmem:[#allocation6 + $0x18] sm:$0xff]   ;;  %v1050_v11 = vld [vmem:[#allocation6 + $0x20] sm:$0xff]  }
  0x4f   :  { %897 = vmatprep.subr.bf16.mxu0 %v1021_v24  ;;  %v1051_v12 = vld [vmem:[#allocation6 + $0x28] sm:$0xff]   ;;  %v1052_v13 = vld [vmem:[#allocation6 + $0x30] sm:$0xff]   ;;  %v1053_v14 = vld [vmem:[#allocation6 + $0x38] sm:$0xff]  }
  0x50   :  { %918 = vmatpush3.bf16.msra.mxu1 %v1020_v23  ;;  %v816_v16 = vld [vmem:[%s1229_s2] ss:$0 sm:$0xff] }
  0x51   :  { %919 = vmatprep.subr.bf16.mxu1 %v1023_v26 }
  0x52   :  { %898 = vmatpush3.bf16.msra.mxu0 %v1022_v25 }
  0x53   :  { %899 = vmatprep.subr.bf16.mxu0 %v1025_v28 }
  0x54   :  { %920 = vmatpush3.bf16.msra.mxu1 %v1024_v27 }
  0x55   :  { %921 = vmatprep.subr.bf16.mxu1 %v1027_v30 }
  0x56   :  { %900 = vmatpush3.bf16.msra.mxu0 %v1026_v29 }
  0x57   :  { %929 = vmatprep.subr.bf16.mxu0 %v1029_v38 }
  0x58   :  { %922 = vmatpush3.bf16.msra.mxu1 %v1028_v34 }
  0x59   :  { %962 = vmatprep.subr.bf16.mxu1 %v1131_v43  ;;  %519 = vmatmul.mubr.bf16.vlgmr.msra.gmra.mrb[0].mxu0 %v76_v37 }
  0x5a   :  { %930 = vmatpush3.bf16.msra.mxu0 %v1030_v42  ;;  %600 = vmatprep.mubr.bf16.mxu0 %v81_v61 }
  0x5b   :  { %560 = vmatmul.mubr.bf16.vlgmr.msra.gmra.mrb[0].mxu1 %v78_v46  ;;  %931 = vmatprep.subr.bf16.mxu0 %v1031_v47 }
  0x5c   :  { %964 = vmatprep.mubr.msk.bf16.mxu1 %vm1132_vm0, %v1131_v43  ;;  %963 = vmatpush3.bf16.msra.mxu1 %v1045_v56 }
  0x5d   :  { %968 = vmatprep.subr.bf16.mxu1 %v1131_v43 }
  0x5e   :  { %932 = vmatpush3.bf16.msra.mxu0 %v1032_v48 }
  0x5f   :  { %933 = vmatprep.subr.bf16.mxu0 %v1033_v49  ;;  %v867_v49 = vld [vmem:[%s1231_s4] ss:$0 sm:$0xff] }
  0x62   :  { %934 = vmatpush3.bf16.msra.mxu0 %v1034_v50 }
  0x63   :  { %935 = vmatprep.subr.bf16.mxu0 %v1035_v51  ;;  %965 = vmatmul.mubr.msk.bf16.vlgmr.msra.gmra.mrb[4].mxu1 %vm482_vm1, %v82_v0 }
  0x64   :  { %984 = vmatprep.mubr.msk.bf16.mxu1 %vm1132_vm0, %v1131_v43  ;;  %969 = vmatpush3.bf16.msra.mxu1 %v1046_v7 }
  0x65   :  { %970 = vmatprep.subr.bf16.mxu1 %v1131_v43 }
  0x66   :  { %936 = vmatpush3.bf16.msra.mxu0 %v1036_v52 }
  0x67   :  { %937 = vmatprep.subr.bf16.mxu0 %v1037_v53 }
  0x68   :  { %971 = vmatpush3.bf16.msra.mxu1 %v1047_v8 }
  0x69   :  { %972 = vmatprep.subr.bf16.mxu1 %v1131_v43 }
  0x6a   :  { %938 = vmatpush3.bf16.msra.mxu0 %v1038_v54 }
  0x6b   :  { %939 = vmatprep.subr.bf16.mxu0 %v1039_v55 }
  0x6c   :  { %973 = vmatpush3.bf16.msra.mxu1 %v1048_v9 }
  0x6d   :  { %974 = vmatprep.subr.bf16.mxu1 %v1131_v43 }
  0x6e   :  { %940 = vmatpush3.bf16.msra.mxu0 %v1040_v58 }
  0x6f   :  { %941 = vmatprep.subr.bf16.mxu0 %v1041_v59 }
  0x70   :  { %975 = vmatpush3.bf16.msra.mxu1 %v1049_v10 }
  0x71   :  { %976 = vmatprep.subr.bf16.mxu1 %v1131_v43 }
  0x72   :  { %942 = vmatpush3.bf16.msra.mxu0 %v1042_v1 }
  0x73   :  { %943 = vmatprep.subr.bf16.mxu0 %v1043_v2 }
  0x74   :  { %977 = vmatpush3.bf16.msra.mxu1 %v1050_v11 }
  0x75   :  { %978 = vmatprep.subr.bf16.mxu1 %v1131_v43 }
  0x76   :  { %944 = vmatpush3.bf16.msra.mxu0 %v1044_v3 }
  0x78   :  { %979 = vmatpush3.bf16.msra.mxu1 %v1051_v12 }
  0x79   :  { %601 = vmatmul.mubr.bf16.vlgmr.msra.gmra.mrb[4].mxu0 %v80_v6  ;;  %980 = vmatprep.subr.bf16.mxu1 %v1131_v43 }
  0x7c   :  { %981 = vmatpush3.bf16.msra.mxu1 %v1052_v13 }
  0x7d   :  { %982 = vmatprep.subr.bf16.mxu1 %v1131_v43 }
  0x80   :  { %983 = vmatpush3.bf16.msra.mxu1 %v1053_v14 }
 0x12c   :  { %v901_v15 = vpop.f32.mrb[0].mxu0 }
 0x12d   :  { %v902_v17 = vpop.f32.mrb[1].mxu0 }
 0x12e   :  { %v903_v18 = vadd.f32 %v902_v17, %v901_v15  ;;  %v904_v19 = vpop.f32.mrb[2].mxu0  ;;  %v923_v20 = vpop.f32.mrb[0].mxu1 }
 0x12f   :  { %v905_v21 = vpop.f32.mrb[3].mxu0  ;;  %v924_v24 = vpop.f32.mrb[1].mxu1 }
 0x130   :  { %v521_v22 = vadd.f32 %v903_v18, %v816_v16  ;;  %v906_v23 = vadd.f32 %v905_v21, %v904_v19  ;;  %v925_v25 = vadd.f32 %v924_v24, %v923_v20  ;;  %v926_v26 = vpop.f32.mrb[2].mxu1 }
 0x131   :  { %v927_v28 = vpop.f32.mrb[3].mxu1 }
 0x132   :  { %v524_v27 = vadd.f32 %v906_v23, %v816_v16  ;;  %v562_v29 = vadd.f32 %v925_v25, %v521_v22  ;;  %v928_v30 = vadd.f32 %v927_v28, %v926_v26 }
 0x134   :  { %v565_v31 = vadd.f32 %v928_v30, %v524_v27 }
 0x136   :  { %v643_v32 = vpop.f32.mrb[4].mxu1 }
 0x137   :  { %v966_v33 = vpop.f32.mrb[5].mxu1 }
 0x138   :  { %v646_v34 = vpop.f32.mrb[6].mxu1 }
 0x139   :  { %v967_v35 = vpop.f32.mrb[7].mxu1 }
 0x14c   :  { %v945_v36 = vpop.f32.mrb[4].mxu0 }
 0x14d   :  { %v946_v37 = vpop.f32.mrb[5].mxu0 }
 0x14e   :  { %v947_v38 = vadd.f32 %v946_v37, %v945_v36  ;;  %v948_v39 = vpop.f32.mrb[6].mxu0 }
 0x14f   :  { %v949_v40 = vpop.f32.mrb[7].mxu0 }
 0x150   :  { %v603_v41 = vadd.f32 %v947_v38, %v562_v29  ;;  %v950_v42 = vadd.f32 %v949_v40, %v948_v39 }
 0x152   :  { %v644_v43 = vadd.f32 %v643_v32, %v603_v41  ;;  %v606_v44 = vadd.f32 %v950_v42, %v565_v31 }
 0x154   :  { %v647_v45 = vadd.f32 %v646_v34, %v606_v44  ;;  %v650_v46 = vmax.f32 %v644_v43, 0.0 }
 0x156   :  { %v651_v47 = vmax.f32 %v647_v45, 0.0 }
 0x158   :  { %v652_v48 = vpack.c.bf16 %v651_v47, %v650_v46 }
 0x15a   :  { %985 = vmatmul.mubr.bf16.vlgmr.msra.gmra.mrb[8].mxu1 %v652_v48 }
 0x22d   :  { %v758_v50 = vpop.f32.mrb[8].mxu1 }
 0x22e   :  { %v986_v51 = vpop.f32.mrb[9].mxu1  ;;  %v759_v53 = vadd.f32 %v867_v49, %v758_v50 }
 0x22f   :  { %v761_v52 = vpop.f32.mrb[10].mxu1 }
 0x230   :  { %v762_v54 = vadd.f32 %v867_v49, %v761_v52  ;;  %v987_v55 = vpop.f32.mrb[11].mxu1 }
 0x232   :  { %v883_v56 = vpack.c.bf16 %v762_v54, %v759_v53 }
 0x234   :  { %884 = vst [vmem:[#allocation7] sm:$0xff] %v883_v56  }
 0x23b   :  { %v792_v57 = vld [vmem:[#allocation7] sm:$0xf] }
 0x23c   :  { %793 = vst [vmem:[%s1232_s5] sm:$0xf] %v792_v57 }
 0x23d   :  { %810 = vsyncpa [#allocation3], 1 }
 0x23e   :  { %811 = vsyncpa [#allocation5], 1 }

</bundles_post_ra>
